<compile_context>
chip_gen: v7x
topology: tpu7x:2x2x1
jax: 0.10.0
libtpu: 0.0.40
codegen_flags: <defaults>
</compile_context>

<pallas_src>
import jax
import jax.numpy as jnp
from jax.experimental import pallas as pl
from jax.experimental.pallas import tpu as pltpu


_VPU_CMID_MAX = 16        # below this, the second projection uses VPU broadcast-FMAs
_MAX_TILE_BYTES = 8 << 20  # per-block byte budget (fits v7x 64 MiB VMEM with headroom)
_MIN_GRID = 4              # prefer >= 2 grid steps per TensorCore (v7x has 2 TCs)
_MAX_NB = 32               # cap batch elements packed per step (loop is unrolled)


def _excite_tile(x, w1, b1, w2, b2):
    """One (C, T) f32 tile: x * sigmoid(w2 @ relu(w1 @ x + b1) + b2)."""
    # First projection: MXU, bf16 operands (w1 is passed as bf16), f32 accumulate.
    h = jnp.dot(w1, x.astype(w1.dtype), preferred_element_type=jnp.float32) + b1
    h = jnp.maximum(h, 0.0)                                      # ReLU
    c, cmid = w2.shape
    if cmid <= _VPU_CMID_MAX:
        # Tiny contraction: Cmid scalar-broadcast FMAs per output vreg on the VPU.
        s = b2                                                   # (C, 1)
        for m in range(cmid):
            s = s + w2[:, m:m + 1] * h[m:m + 1, :]               # (C,1)*(1,T) -> (C,T)
    else:
        # Large Cmid: keep the MXU, bf16 operands (w2 passed as bf16).
        s = jnp.dot(w2, h.astype(w2.dtype), preferred_element_type=jnp.float32) + b2
    # sigmoid(z) == 0.5 * (tanh(z/2) + 1): a single EUP transcendental.
    s = 0.5 * (jnp.tanh(0.5 * s) + 1.0)
    return x * s


def _excitation_kernel_spatial(x_ref, w1_ref, b1_ref, w2_ref, b2_ref, o_ref):
    # x_ref / o_ref: (C, T) -- batch dim squeezed away by the BlockSpec.
    y = _excite_tile(x_ref[...], w1_ref[...], b1_ref[...], w2_ref[...], b2_ref[...])
    o_ref[...] = y.astype(o_ref.dtype)


def _excitation_kernel_batched(x_ref, w1_ref, b1_ref, w2_ref, b2_ref, o_ref):
    # x_ref / o_ref: (Nb, C, HW).  Nb is static and small -> trace-time unrolled.
    w1 = w1_ref[...]
    b1 = b1_ref[...]
    w2 = w2_ref[...]
    b2 = b2_ref[...]
    for b in range(x_ref.shape[0]):
        o_ref[b] = _excite_tile(x_ref[b], w1, b1, w2, b2).astype(o_ref.dtype)


def _divisors(n):
    out = set()
    d = 1
    while d * d <= n:
        if n % d == 0:
            out.add(d)
            out.add(n // d)
        d += 1
    return sorted(out)


def _choose_blocking(n_batch, c, hw, itemsize, *,
                     max_tile_bytes=_MAX_TILE_BYTES, min_grid=_MIN_GRID):
    """Returns (mode, Nb, T) with mode in {"batch", "spatial"}."""
    per_image = c * hw * itemsize
    if per_image <= max_tile_bytes:
        # Small-HW regime: pack several whole images per grid step.
        divisors = [d for d in range(1, n_batch + 1) if n_batch % d == 0]
        fitting = [d for d in divisors
                   if d * per_image <= max_tile_bytes and d <= _MAX_NB]
        good = [d for d in fitting if n_batch // d >= min_grid]
        nb = max(good) if good else max(fitting)
        return "batch", nb, hw
    # Large-HW regime: spatial tiling within each image; lane-dense T | HW.
    cands = [t for t in range(128, hw + 1, 128) if hw % t == 0]
    if not cands:
        cands = [t for t in _divisors(hw) if t > 1] or [hw]
    fitting = [t for t in cands if c * t * itemsize <= max_tile_bytes]
    if not fitting:
        fitting = [min(cands)]
    good = [t for t in fitting if n_batch * (hw // t) >= min_grid]
    t = max(good) if good else max(fitting)
    return "spatial", 1, t


def excitation_pallas(x_nchw, w1, b1, w2, b2):
    """x_nchw: (N, C, H, W). w1: (Cmid, C), b1: (Cmid,), w2: (C, Cmid), b2: (C,).
    Weight shapes match nn.Conv2d(..., kernel_size=1) weights with the 1x1 squeezed."""
    N, C, H, W = x_nchw.shape
    Cmid = w1.shape[0]
    HW = H * W
    itemsize = jnp.dtype(x_nchw.dtype).itemsize

    mode, Nb, T = _choose_blocking(N, C, HW, itemsize)

    # NCHW -> (N, C, HW): pure reshape of trailing dims, no data movement.
    x3 = x_nchw.reshape(N, C, HW)

    # Operand dtype plumbing: bf16 for whatever stays on the MXU (gate path is
    # numerically insensitive); VPU second-projection path keeps w2 in f32.
    use_vpu_second = Cmid <= _VPU_CMID_MAX
    w1_in = w1.astype(jnp.bfloat16)
    w2_in = w2.astype(jnp.float32) if use_vpu_second else w2.astype(jnp.bfloat16)
    b1_2d = b1.reshape(Cmid, 1).astype(jnp.float32)
    b2_2d = b2.reshape(C, 1).astype(jnp.float32)

    # Explicit VMEM budget: double-buffered in+out tiles + weights/headroom,
    # clamped to 75% of this chip's VMEM capacity (64 MiB/TC on v7x).
    tile_bytes = Nb * C * T * itemsize
    try:
        vmem_cap = int(getattr(pltpu.get_tpu_info(), "vmem_capacity_bytes", 64 << 20))
    except Exception:
        vmem_cap = 64 << 20
    vmem_bytes = int(min(max(4 * tile_bytes + (2 << 20), 16 << 20),
                         (vmem_cap * 3) // 4))

    if mode == "batch":
        grid = (N // Nb,)
        x_spec = pl.BlockSpec((Nb, C, T), lambda i: (i, 0, 0))
        o_spec = pl.BlockSpec((Nb, C, T), lambda i: (i, 0, 0))
        w1_spec = pl.BlockSpec((Cmid, C), lambda i: (0, 0))
        b1_spec = pl.BlockSpec((Cmid, 1), lambda i: (0, 0))
        w2_spec = pl.BlockSpec((C, Cmid), lambda i: (0, 0))
        b2_spec = pl.BlockSpec((C, 1), lambda i: (0, 0))
        kernel = _excitation_kernel_batched
        dims = ("parallel",)
    else:
        grid = (N, HW // T)
        x_spec = pl.BlockSpec((pl.Squeezed(), C, T), lambda n, j: (n, 0, j))
        o_spec = pl.BlockSpec((pl.Squeezed(), C, T), lambda n, j: (n, 0, j))
        w1_spec = pl.BlockSpec((Cmid, C), lambda n, j: (0, 0))
        b1_spec = pl.BlockSpec((Cmid, 1), lambda n, j: (0, 0))
        w2_spec = pl.BlockSpec((C, Cmid), lambda n, j: (0, 0))
        b2_spec = pl.BlockSpec((C, 1), lambda n, j: (0, 0))
        kernel = _excitation_kernel_spatial
        dims = ("parallel", "parallel")

    out = pl.pallas_call(
        kernel,
        out_shape=jax.ShapeDtypeStruct((N, C, HW), x_nchw.dtype),
        grid_spec=pltpu.PrefetchScalarGridSpec(
            num_scalar_prefetch=0,
            grid=grid,
            in_specs=[x_spec, w1_spec, b1_spec, w2_spec, b2_spec],
            out_specs=o_spec,
        ),
        compiler_params=pltpu.CompilerParams(
            dimension_semantics=dims,
            vmem_limit_bytes=vmem_bytes,
        ),
    )(x3, w1_in, b1_2d, w2_in, b2_2d)

    return out.reshape(N, C, H, W)


def excitation_ref(x_nchw, w1, b1, w2, b2):
    """Pure-JAX f32 reference of the PyTorch forward (1x1 convs == per-pixel matmuls)."""
    h = jnp.einsum("nchw,mc->nmhw", x_nchw, w1) + b1[None, :, None, None]
    h = jnp.maximum(h, 0.0)
    s = jnp.einsum("nmhw,cm->nchw", h, w2) + b2[None, :, None, None]
    s = jax.nn.sigmoid(s)
    return x_nchw * s


def _run_case(key, N, C, H, W, reduction, tol):
    Cmid = C // reduction
    kx, k1, k2, k3, k4 = jax.random.split(key, 5)
    x = jax.random.normal(kx, (N, C, H, W), dtype=jnp.float32)
    w1 = jax.random.normal(k1, (Cmid, C), dtype=jnp.float32) * 0.1
    b1 = jax.random.normal(k2, (Cmid,), dtype=jnp.float32) * 0.1
    w2 = jax.random.normal(k3, (C, Cmid), dtype=jnp.float32) * 0.1
    b2 = jax.random.normal(k4, (C,), dtype=jnp.float32) * 0.1

    y = excitation_pallas(x, w1, b1, w2, b2)
    y = jax.block_until_ready(y)
    y_ref = excitation_ref(x, w1, b1, w2, b2)
    assert y.shape == (N, C, H, W)
    assert jnp.allclose(y, y_ref, atol=tol, rtol=tol), (
        f"mismatch: max abs err {jnp.max(jnp.abs(y - y_ref))}")
    return y


if __name__ == "__main__":
    key = jax.random.PRNGKey(0)
    k_a, k_b = jax.random.split(key, 2)

    # Case A (module's typical SE block): small feature map -> batch-packed
    # blocks, VPU broadcast-FMA second projection (Cmid = 2).
    _run_case(k_a, N=2, C=32, H=16, W=16, reduction=16, tol=1e-2)

    # Case B: large feature map -> spatial tiling (squeezed batch dim) and the
    # MXU bf16 path for the second projection (Cmid = 32 > 16).
    _run_case(k_b, N=1, C=64, H=256, W=256, reduction=2, tol=2e-2)

    print("KERNEL_OK")
</pallas_src>

<mosaic_0001>
module attributes {stable_mosaic.version = 11 : i64} {
  func.func @_excitation_kernel_batched(%arg0: i32, %arg1: memref<2x32x256xf32, #tpu.memory_space<vmem>>, %arg2: memref<2x32xbf16, #tpu.memory_space<vmem>>, %arg3: memref<2x1xf32, #tpu.memory_space<vmem>>, %arg4: memref<32x2xf32, #tpu.memory_space<vmem>>, %arg5: memref<32x1xf32, #tpu.memory_space<vmem>>, %arg6: memref<2x32x256xf32, #tpu.memory_space<vmem>>) attributes {dimension_semantics = [#tpu.dimension_semantics<parallel>], iteration_bounds = array<i64: 1>, scalar_prefetch = 0 : i64, scratch_operands = 0 : i64, tpu.core_type = #tpu.core_type<tc>, window_params = [{transform_indices = @transform_0, window_bounds = array<i64: 2, 32, 256>}, {pipeline_mode = #tpu.pipeline_mode<synchronous>, transform_indices = @transform_1, window_bounds = array<i64: 2, 32>}, {pipeline_mode = #tpu.pipeline_mode<synchronous>, transform_indices = @transform_2, window_bounds = array<i64: 2, 1>}, {pipeline_mode = #tpu.pipeline_mode<synchronous>, transform_indices = @transform_3, window_bounds = array<i64: 32, 2>}, {pipeline_mode = #tpu.pipeline_mode<synchronous>, transform_indices = @transform_4, window_bounds = array<i64: 32, 1>}, {transform_indices = @transform_5, window_bounds = array<i64: 2, 32, 256>}]} {
    %c0 = arith.constant 0 : index
    %c0_0 = arith.constant 0 : index
    %0 = vector.load %arg2[%c0, %c0_0] : memref<2x32xbf16, #tpu.memory_space<vmem>>, vector<2x32xbf16>
    %c0_1 = arith.constant 0 : index
    %c0_2 = arith.constant 0 : index
    %1 = vector.load %arg3[%c0_1, %c0_2] : memref<2x1xf32, #tpu.memory_space<vmem>>, vector<2x1xf32>
    %c0_3 = arith.constant 0 : index
    %c0_4 = arith.constant 0 : index
    %2 = vector.load %arg4[%c0_3, %c0_4] : memref<32x2xf32, #tpu.memory_space<vmem>>, vector<32x2xf32>
    %c0_5 = arith.constant 0 : index
    %c0_6 = arith.constant 0 : index
    %3 = vector.load %arg5[%c0_5, %c0_6] : memref<32x1xf32, #tpu.memory_space<vmem>>, vector<32x1xf32>
    %c0_7 = arith.constant 0 : index
    %c0_8 = arith.constant 0 : index
    %c0_9 = arith.constant 0 : index
    %4 = vector.load %arg1[%c0_7, %c0_8, %c0_9] : memref<2x32x256xf32, #tpu.memory_space<vmem>>, vector<1x32x256xf32>
    %5 = vector.shape_cast %4 : vector<1x32x256xf32> to vector<32x256xf32>
    %6 = arith.truncf %5 : vector<32x256xf32> to vector<32x256xbf16>
    %cst = arith.constant dense<0.000000e+00> : vector<2x256xf32>
    %7 = tpu.matmul %0, %6, %cst {dimension_numbers = #tpu.dot_dimension_numbers<[1], [0], [0], [1], [0, 0, 1, 1], [], []>} : vector<2x32xbf16>, vector<32x256xbf16>, vector<2x256xf32> -> vector<2x256xf32>
    %8 = vector.broadcast %1 : vector<2x1xf32> to vector<2x256xf32>
    %9 = arith.addf %7, %8 : vector<2x256xf32>
    %cst_10 = arith.constant 0.000000e+00 : f32
    %10 = vector.broadcast %cst_10 : f32 to vector<2x256xf32>
    %11 = arith.maximumf %9, %10 : vector<2x256xf32>
    %12 = vector.extract_strided_slice %2 {offsets = [0, 0], sizes = [32, 1], strides = [1, 1]} : vector<32x2xf32> to vector<32x1xf32>
    %13 = vector.extract_strided_slice %11 {offsets = [0, 0], sizes = [1, 256], strides = [1, 1]} : vector<2x256xf32> to vector<1x256xf32>
    %14 = vector.broadcast %12 : vector<32x1xf32> to vector<32x256xf32>
    %15 = vector.broadcast %13 : vector<1x256xf32> to vector<32x256xf32>
    %16 = arith.mulf %14, %15 : vector<32x256xf32>
    %17 = vector.broadcast %3 : vector<32x1xf32> to vector<32x256xf32>
    %18 = arith.addf %17, %16 : vector<32x256xf32>
    %19 = vector.extract_strided_slice %2 {offsets = [0, 1], sizes = [32, 1], strides = [1, 1]} : vector<32x2xf32> to vector<32x1xf32>
    %20 = vector.extract_strided_slice %11 {offsets = [1, 0], sizes = [1, 256], strides = [1, 1]} : vector<2x256xf32> to vector<1x256xf32>
    %21 = vector.broadcast %19 : vector<32x1xf32> to vector<32x256xf32>
    %22 = vector.broadcast %20 : vector<1x256xf32> to vector<32x256xf32>
    %23 = arith.mulf %21, %22 : vector<32x256xf32>
    %24 = arith.addf %18, %23 : vector<32x256xf32>
    %cst_11 = arith.constant 5.000000e-01 : f32
    %25 = vector.broadcast %cst_11 : f32 to vector<32x256xf32>
    %26 = arith.mulf %25, %24 : vector<32x256xf32>
    %27 = math.tanh %26 : vector<32x256xf32>
    %cst_12 = arith.constant 1.000000e+00 : f32
    %28 = vector.broadcast %cst_12 : f32 to vector<32x256xf32>
    %29 = arith.addf %27, %28 : vector<32x256xf32>
    %cst_13 = arith.constant 5.000000e-01 : f32
    %30 = vector.broadcast %cst_13 : f32 to vector<32x256xf32>
    %31 = arith.mulf %30, %29 : vector<32x256xf32>
    %32 = arith.mulf %5, %31 : vector<32x256xf32>
    %c0_14 = arith.constant 0 : index
    %c0_15 = arith.constant 0 : index
    %c0_16 = arith.constant 0 : index
    %33 = vector.load %arg6[%c0_14, %c0_15, %c0_16] : memref<2x32x256xf32, #tpu.memory_space<vmem>>, vector<1x32x256xf32>
    %34 = vector.shape_cast %33 : vector<1x32x256xf32> to vector<32x256xf32>
    %35 = vector.shape_cast %32 : vector<32x256xf32> to vector<1x32x256xf32>
    tpu.vector_store %arg6[%c0_14, %c0_15, %c0_16], %35 {strides = array<i32>} : memref<2x32x256xf32, #tpu.memory_space<vmem>>, vector<1x32x256xf32>,
    %c1 = arith.constant 1 : index
    %c0_17 = arith.constant 0 : index
    %c0_18 = arith.constant 0 : index
    %36 = vector.load %arg1[%c1, %c0_17, %c0_18] : memref<2x32x256xf32, #tpu.memory_space<vmem>>, vector<1x32x256xf32>
    %37 = vector.shape_cast %36 : vector<1x32x256xf32> to vector<32x256xf32>
    %38 = arith.truncf %37 : vector<32x256xf32> to vector<32x256xbf16>
    %cst_19 = arith.constant dense<0.000000e+00> : vector<2x256xf32>
    %39 = tpu.matmul %0, %38, %cst_19 {dimension_numbers = #tpu.dot_dimension_numbers<[1], [0], [0], [1], [0, 0, 1, 1], [], []>} : vector<2x32xbf16>, vector<32x256xbf16>, vector<2x256xf32> -> vector<2x256xf32>
    %40 = vector.broadcast %1 : vector<2x1xf32> to vector<2x256xf32>
    %41 = arith.addf %39, %40 : vector<2x256xf32>
    %cst_20 = arith.constant 0.000000e+00 : f32
    %42 = vector.broadcast %cst_20 : f32 to vector<2x256xf32>
    %43 = arith.maximumf %41, %42 : vector<2x256xf32>
    %44 = vector.extract_strided_slice %2 {offsets = [0, 0], sizes = [32, 1], strides = [1, 1]} : vector<32x2xf32> to vector<32x1xf32>
    %45 = vector.extract_strided_slice %43 {offsets = [0, 0], sizes = [1, 256], strides = [1, 1]} : vector<2x256xf32> to vector<1x256xf32>
    %46 = vector.broadcast %44 : vector<32x1xf32> to vector<32x256xf32>
    %47 = vector.broadcast %45 : vector<1x256xf32> to vector<32x256xf32>
    %48 = arith.mulf %46, %47 : vector<32x256xf32>
    %49 = vector.broadcast %3 : vector<32x1xf32> to vector<32x256xf32>
    %50 = arith.addf %49, %48 : vector<32x256xf32>
    %51 = vector.extract_strided_slice %2 {offsets = [0, 1], sizes = [32, 1], strides = [1, 1]} : vector<32x2xf32> to vector<32x1xf32>
    %52 = vector.extract_strided_slice %43 {offsets = [1, 0], sizes = [1, 256], strides = [1, 1]} : vector<2x256xf32> to vector<1x256xf32>
    %53 = vector.broadcast %51 : vector<32x1xf32> to vector<32x256xf32>
    %54 = vector.broadcast %52 : vector<1x256xf32> to vector<32x256xf32>
    %55 = arith.mulf %53, %54 : vector<32x256xf32>
    %56 = arith.addf %50, %55 : vector<32x256xf32>
    %cst_21 = arith.constant 5.000000e-01 : f32
    %57 = vector.broadcast %cst_21 : f32 to vector<32x256xf32>
    %58 = arith.mulf %57, %56 : vector<32x256xf32>
    %59 = math.tanh %58 : vector<32x256xf32>
    %cst_22 = arith.constant 1.000000e+00 : f32
    %60 = vector.broadcast %cst_22 : f32 to vector<32x256xf32>
    %61 = arith.addf %59, %60 : vector<32x256xf32>
    %cst_23 = arith.constant 5.000000e-01 : f32
    %62 = vector.broadcast %cst_23 : f32 to vector<32x256xf32>
    %63 = arith.mulf %62, %61 : vector<32x256xf32>
    %64 = arith.mulf %37, %63 : vector<32x256xf32>
    %c1_24 = arith.constant 1 : index
    %c0_25 = arith.constant 0 : index
    %c0_26 = arith.constant 0 : index
    %65 = vector.load %arg6[%c1_24, %c0_25, %c0_26] : memref<2x32x256xf32, #tpu.memory_space<vmem>>, vector<1x32x256xf32>
    %66 = vector.shape_cast %65 : vector<1x32x256xf32> to vector<32x256xf32>
    %67 = vector.shape_cast %64 : vector<32x256xf32> to vector<1x32x256xf32>
    tpu.vector_store %arg6[%c1_24, %c0_25, %c0_26], %67 {strides = array<i32>} : memref<2x32x256xf32, #tpu.memory_space<vmem>>, vector<1x32x256xf32>,
    return
  }
  func.func @transform_0(%arg0: i32) -> (i32, i32, i32) {
    %c0_i32 = arith.constant 0 : i32
    %c0_i32_0 = arith.constant 0 : i32
    %c0_i32_1 = arith.constant 0 : i32
    return %arg0, %c0_i32, %c0_i32_0 : i32, i32, i32
  }
  func.func @transform_1(%arg0: i32) -> (i32, i32) {
    %c0_i32 = arith.constant 0 : i32
    %c0_i32_0 = arith.constant 0 : i32
    %c0_i32_1 = arith.constant 0 : i32
    return %c0_i32, %c0_i32_0 : i32, i32
  }
  func.func @transform_2(%arg0: i32) -> (i32, i32) {
    %c0_i32 = arith.constant 0 : i32
    %c0_i32_0 = arith.constant 0 : i32
    %c0_i32_1 = arith.constant 0 : i32
    return %c0_i32, %c0_i32_0 : i32, i32
  }
  func.func @transform_3(%arg0: i32) -> (i32, i32) {
    %c0_i32 = arith.constant 0 : i32
    %c0_i32_0 = arith.constant 0 : i32
    %c0_i32_1 = arith.constant 0 : i32
    return %c0_i32, %c0_i32_0 : i32, i32
  }
  func.func @transform_4(%arg0: i32) -> (i32, i32) {
    %c0_i32 = arith.constant 0 : i32
    %c0_i32_0 = arith.constant 0 : i32
    %c0_i32_1 = arith.constant 0 : i32
    return %c0_i32, %c0_i32_0 : i32, i32
  }
  func.func @transform_5(%arg0: i32) -> (i32, i32, i32) {
    %c0_i32 = arith.constant 0 : i32
    %c0_i32_0 = arith.constant 0 : i32
    %c0_i32_1 = arith.constant 0 : i32
    return %arg0, %c0_i32, %c0_i32_0 : i32, i32, i32
  }
}

</mosaic_0001>

<bundles_post_ra>
// kernel: tpu_custom_call.1
= control target key start
LH: loop header
LB: loop body
LE: loop exit
PB: predicated region body
PF: predicated region fallthrough
CT: control target
= control target key end

     0   :  { %10 = vsyncpa [#allocation3], 0  ;;  %s792_s0 = inlined_call_operand.hbm [shape: f32[2,32,256], index: 0, kind: input, shape index: {}]   ;;  %s793_s1 = inlined_call_operand.vmem [shape: bf16[2,32], index: 1, kind: input, shape index: {}]   ;;  %s794_s2 = inlined_call_operand.vmem [shape: f32[2,1], index: 2, kind: input, shape index: {}]   ;;  %s795_s3 = inlined_call_operand.vmem [shape: f32[32,2], index: 3, kind: input, shape index: {}]   ;;  %s796_s4 = inlined_call_operand.vmem [shape: f32[32,1], index: 4, kind: input, shape index: {}]   ;;  %s797_s5 = inlined_call_operand.hbm [shape: f32[2,32,256], index: 5, kind: output, shape index: {}]  }
   0x1   :  { %11 = vsyncpa [#allocation4], 0  ;;  %s524_s18 = smov [#allocation2]   ;;  %s476_s22 = scalar_lea.hbm %s792_s0, 2048 }
   0x2   :  { %s17_s19 = sshll.u32 %s524_s18, 4  ;;  %p477_p0 = scmp.ne.s32.totalorder %s792_s0, %s476_s22  ;;  %s18_s19 = int_to_ptr.vmem [resolvable:$true] %s17_s19 }
   0x3   :  { %p480_p1 = scmp.lt.u32.totalorder %s476_s22, %s792_s0 }
   0x5   :  { %p482_p2 = pnand %p480_p1, %p477_p0 }
   0x7   :  { %485 = shalt.err (!%p482_p2)
}
   0x8   :  { %s486_s27 = scalar_lea.vmem %s18_s19, 2048  ;;  %p491_p4 = scmp.lt.s32.totalorder %s18_s19, %s18_s19 }
   0x9   :  { %p487_p3 = scmp.ne.s32.totalorder %s18_s19, %s486_s27  ;;  %p492_p5 = scmp.lt.s32.totalorder %s486_s27, %s486_s27 }
   0xb   :  { %p493_p6 = por %p492_p5, %p491_p4 }
   0xd   :  { %p494_p7 = pnand %p493_p6, %p487_p3 }
   0xf   :  { %497 = shalt.err (!%p494_p7)
}
  0x10   :  { %s525_s28 = smov 256   ;;  %s526_s29 = smov 16  }
  0x11   :  { %23 = dma.hbm_to_vmem [thread:$0]  %s792_s0, 2048, %s18_s19, [#allocation3], %s525_s28, %s525_s28, %s526_s29  }
  0x12   :  { %520 = dma.done.wait [#allocation3], 2048  }
  0x13   :  { %521 = vsyncadd [#allocation3], 4294965248  ;;  %v527_v0 = vmov 0   ;;  %v575_v1 = vld [vmem:[#allocation2 + $0x8] sm:$0xff]  ;;  %v577_v2 = vld [vmem:[#allocation2 + $0x18] sm:$0xff]  ;;  %vm63_vm0 = vcmask 261120   ;;  %v130_v42 = vlaneseq }
  0x14   :  { %99 = vmatprep.mubr.bf16.mxu0 %v527_v0  ;;  %307 = vmatprep.mubr.bf16.mxu1 %v527_v0  ;;  %v579_v3 = vld [vmem:[#allocation2 + $0x48] sm:$0xff]  ;;  %v55_v4 = vpack.c.bf16 %v577_v2, %v575_v1  ;;  %v583_v5 = vld [vmem:[#allocation2 + $0x58] sm:$0xff]  ;;  %v585_v6 = vld [vmem:[#allocation2] sm:$0xff]  ;;  %v528_v35 = vmov 1  }
  0x15   :  { %441 = vset.pattern.permute.xlu1 %v527_v0  ;;  %440 = vset.pattern.permute.xlu0 %v527_v0  ;;  %v587_v7 = vld [vmem:[#allocation2 + $0x10] sm:$0xff]  ;;  %v272_v8 = vpack.c.bf16 %v583_v5, %v579_v3  ;;  %v593_v10 = vld [vmem:[#allocation2 + $0x40] sm:$0xff]  ;;  %v597_v12 = vld [vmem:[#allocation2 + $0x28] sm:$0xff]  ;;  %v131_v44 = vshrl.u32 %v130_v42, 7 }
  0x16   :  { %v54_v9 = vpack.c.bf16 %v587_v7, %v585_v6  ;;  %v595_v11 = vld [vmem:[#allocation2 + $0x50] sm:$0xff]  ;;  %67 = vmatprep.subr.bf16.mxu0 %v55_v4  ;;  %v601_v14 = vld [vmem:[#allocation2 + $0x38] sm:$0xff]  ;;  %v603_v15 = vld [vmem:[#allocation2 + $0x68] sm:$0xff] }
  0x17   :  { %v271_v13 = vpack.c.bf16 %v595_v11, %v593_v10  ;;  %v605_v16 = vld [vmem:[#allocation2 + $0x78] sm:$0xff]  ;;  %275 = vmatprep.subr.bf16.mxu1 %v272_v8  ;;  %v57_v17 = vpack.c.bf16 %v601_v14, %v597_v12  ;;  %v611_v19 = vld [vmem:[#allocation2 + $0x20] sm:$0xff]  ;;  %v613_v20 = vld [vmem:[#allocation2 + $0x30] sm:$0xff]  ;;  %v669_v49 = vsub.s32 0, %v131_v44  ;;  %v671_v50 = vsub.s32 1, %v131_v44 }
  0x18   :  { %68 = vmatpush1.bf16.msra.mxu0 %v54_v9  ;;  %v274_v18 = vpack.c.bf16 %v605_v16, %v603_v15  ;;  %v615_v21 = vld [vmem:[#allocation2 + $0x60] sm:$0xff]  ;;  %v56_v22 = vpack.c.bf16 %v613_v20, %v611_v19  ;;  %v619_v23 = vld [vmem:[#allocation2 + $0x70] sm:$0xff]  ;;  %v39_v24 = vld [vmem:[%s795_s3 + $0x8] sm:$0xff] }
  0x19   :  { %276 = vmatpush1.bf16.msra.mxu1 %v271_v13  ;;  %69 = vmatprep.subr.bf16.mxu0 %v57_v17  ;;  %v273_v25 = vpack.c.bf16 %v619_v23, %v615_v21  ;;  %v37_v26 = vld [vmem:[%s794_s2] sm:$0x3]  ;;  %v40_v28 = vld [vmem:[%s795_s3 + $0x10] sm:$0xff]  ;;  %v41_v31 = vld [vmem:[%s795_s3 + $0x18] sm:$0xff] }
  0x1a   :  { %277 = vmatprep.subr.bf16.mxu1 %v274_v18  ;;  %117 = vperm.xlu1 %441, %v39_v24   ;;  %v36_v27 = vld [vmem:[%s793_s1] sm:$0x1]  ;;  %v44_v32 = vld [vmem:[%s796_s4 + $0x10] sm:$0xff]  ;;  %v43_v33 = vld [vmem:[%s796_s4 + $0x8] sm:$0xff] }
  0x1b   :  { %60 = vperm.xlu0 %440, %v37_v26   ;;  %v38_v29 = vld [vmem:[%s795_s3] sm:$0xff]  ;;  %v45_v34 = vld [vmem:[%s796_s4 + $0x18] sm:$0xff]  ;;  %s529_s3 = smov [#allocation5]  }
  0x1c   :  { %70 = vmatpush1.bf16.msra.mxu0 %v56_v22  ;;  %v42_v30 = vld [vmem:[%s796_s4] sm:$0xff]  ;;  %s420_s4 = sshll.u32 %s529_s3, 4  ;;  %s421_s4 = int_to_ptr.vmem [resolvable:$true] %s420_s4 }
  0x1d   :  { %278 = vmatpush1.bf16.msra.mxu1 %v273_v25  ;;  %s498_s24 = scalar_lea.vmem %s421_s4, 2048  ;;  %p503_p9 = scmp.lt.s32.totalorder %s421_s4, %s421_s4 }
  0x1e   :  { %122 = vperm.xlu1 %441, %v40_v28   ;;  %p499_p8 = scmp.ne.s32.totalorder %s421_s4, %s498_s24  ;;  %p504_p10 = scmp.lt.s32.totalorder %s498_s24, %s498_s24 }
  0x1f   :  { %432 = vmatmul.mubr.msk.bf16.vlgmr.msra.gmra.mrb[0].mxu0 %vm63_vm0, %v36_v27  ;;  %112 = vperm.xlu0 %440, %v38_v29  }
  0x20   :  { %433 = vmatmul.mubr.msk.bf16.vlgmr.msra.gmra.mrb[0].mxu1 %vm63_vm0, %v36_v27  ;;  %p505_p11 = por %p504_p10, %p503_p9 }
  0x22   :  { %148 = vperm.xlu1 %441, %v42_v30   ;;  %p506_p12 = pnand %p505_p11, %p499_p8 }
  0x23   :  { %127 = vperm.xlu0 %440, %v41_v31  }
  0x26   :  { %158 = vperm.xlu1 %441, %v44_v32  }
  0x27   :  { %153 = vperm.xlu0 %440, %v43_v33  }
  0x2a   :  { %442 = vset.pattern.permute.xlu1 %v528_v35 }
  0x2b   :  { %163 = vperm.xlu0 %440, %v45_v34   ;;  %175 = vperm.xlu1 %442, %v38_v29  }
  0x2f   :  { %183 = vperm.xlu1 %442, %v40_v28   ;;  %443 = vset.pattern.permute.xlu0 %v528_v35 }
  0x30   :  { %179 = vperm.xlu0 %443, %v39_v24  }
  0x33   :  { %187 = vperm.xlu1 %442, %v41_v31  }
  0x99   :  { %v653_v36 = vpop.permute.xlu1 %117 }
  0x9a   :  { %v61_v39 = vpop.permute.xlu0 %60 }
  0x9d   :  { %v655_v37 = vpop.permute.xlu1 %122 }
  0x9e   :  { %v661_v41 = vpop.permute.xlu0 %112 }
  0xa1   :  { %v657_v38 = vpop.permute.xlu1 %148 }
  0xa2   :  { %v665_v45 = vpop.permute.xlu0 %127 }
  0xa5   :  { %v659_v40 = vpop.permute.xlu1 %158 }
  0xa6   :  { %v673_v61 = vpop.permute.xlu0 %153 }
  0xaa   :  { %v663_v43 = vpop.permute.xlu1 %175  ;;  %v164_v42 = vpop.permute.xlu0 %163 }
  0xae   :  { %v667_v46 = vpop.permute.xlu1 %183 }
  0xb2   :  { %v188_v32 = vpop.permute.xlu1 %187 }
  0xf2   :  { %v101_v47 = vpop.f32.mrb[0].mxu0 }
  0xf3   :  { %v102_v48 = vadd.f32 %v101_v47, %v61_v39  ;;  %v309_v51 = vpop.f32.mrb[0].mxu1  ;;  %v103_v52 = vpop.f32.mrb[1].mxu0 }
  0xf4   :  { %v310_v53 = vadd.f32 %v309_v51, %v61_v39  ;;  %v104_v54 = vadd.f32 %v103_v52, %v61_v39  ;;  %v311_v55 = vpop.f32.mrb[1].mxu1  ;;  %v105_v56 = vpop.f32.mrb[2].mxu0 }
  0xf5   :  { %v108_v57 = vmax.f32 %v102_v48, 0.0  ;;  %v312_v58 = vadd.f32 %v311_v55, %v61_v39  ;;  %v313_v59 = vpop.f32.mrb[2].mxu1  ;;  %v106_v60 = vpop.f32.mrb[3].mxu0 }
  0xf6   :  { %v316_v62 = vmax.f32 %v310_v53, 0.0  ;;  %v109_v63 = vmax.f32 %v104_v54, 0.0  ;;  %v314_v0 = vpop.f32.mrb[3].mxu1 }
  0xf7   :  { %v133_v4 = vrot.slane %v108_v57, %v669_v49  ;;  %v677_v8 = vrot.slane %v108_v57, %v671_v50  ;;  %v317_v9 = vmax.f32 %v312_v58, 0.0 }
  0xf8   :  { %v680_v13 = vrot.slane %v316_v62, %v669_v49  ;;  %v683_v17 = vrot.slane %v316_v62, %v671_v50  ;;  %v686_v18 = vrot.slane %v109_v63, %v669_v49  ;;  %v689_v22 = vrot.slane %v109_v63, %v671_v50 }
  0xf9   :  { %v138_v24 = vmul.f32 %v133_v4, %v661_v41  ;;  %v142_v25 = vmul.f32 %v133_v4, %v655_v37  ;;  %v198_v26 = vmul.f32 %v677_v8, %v663_v43  ;;  %v202_v27 = vmul.f32 %v677_v8, %v667_v46 }
  0xfa   :  { %v326_v28 = vmul.f32 %v680_v13, %v661_v41  ;;  %v330_v29 = vmul.f32 %v680_v13, %v655_v37  ;;  %v350_v30 = vmul.f32 %v683_v17, %v663_v43  ;;  %v354_v31 = vmul.f32 %v683_v17, %v667_v46 }
  0xfb   :  { %v166_v33 = vadd.f32 %v657_v38, %v138_v24  ;;  %v170_v34 = vadd.f32 %v659_v40, %v142_v25  ;;  %v144_v35 = vmul.f32 %v133_v4, %v665_v45  ;;  %v204_v39 = vmul.f32 %v677_v8, %v188_v32 }
  0xfc   :  { %v334_v44 = vadd.f32 %v326_v28, %v657_v38  ;;  %v338_v47 = vadd.f32 %v330_v29, %v659_v40  ;;  %v332_v48 = vmul.f32 %v680_v13, %v665_v45  ;;  %v356_v51 = vmul.f32 %v683_v17, %v188_v32 }
  0xfd   :  { %v206_v52 = vadd.f32 %v198_v26, %v166_v33  ;;  %v210_v53 = vadd.f32 %v202_v27, %v170_v34  ;;  %v172_v54 = vadd.f32 %v164_v42, %v144_v35  ;;  %v139_v55 = vmul.f32 %v686_v18, %v661_v41 }
  0xfe   :  { %v358_v56 = vadd.f32 %v350_v30, %v334_v44  ;;  %v362_v57 = vadd.f32 %v354_v31, %v338_v47  ;;  %v340_v58 = vadd.f32 %v332_v48, %v164_v42  ;;  %v143_v59 = vmul.f32 %v686_v18, %v655_v37 }
  0xff   :  { %v214_v60 = vmul.f32 0.5, %v206_v52  ;;  %v218_v62 = vmul.f32 0.5, %v210_v53  ;;  %v212_v63 = vadd.f32 %v204_v39, %v172_v54  ;;  %v145_v0 = vmul.f32 %v686_v18, %v665_v45 }
 0x100   :  { %v366_v24 = vmul.f32 0.5, %v358_v56  ;;  %v370_v25 = vmul.f32 0.5, %v362_v57  ;;  %v364_v26 = vadd.f32 %v356_v51, %v340_v58  ;;  %v167_v27 = vadd.f32 %v657_v38, %v139_v55 }
 0x101   :  { %444 = vtanh.f32 %v214_v60  ;;  %v220_v28 = vmul.f32 0.5, %v212_v63  ;;  %v171_v29 = vadd.f32 %v659_v40, %v143_v59  ;;  %v173_v30 = vadd.f32 %v164_v42, %v145_v0 }
 0x102   :  { %446 = vtanh.f32 %v218_v62  ;;  %v372_v31 = vmul.f32 0.5, %v364_v26  ;;  %v199_v33 = vmul.f32 %v689_v22, %v663_v43  ;;  %v203_v34 = vmul.f32 %v689_v22, %v667_v46 }
 0x103   :  { %448 = vtanh.f32 %v366_v24  ;;  %v205_v35 = vmul.f32 %v689_v22, %v188_v32  ;;  %v325_v39 = vrot.slane %v317_v9, %v669_v49  ;;  %v729_v44 = vrot.slane %v317_v9, %v671_v50 }
 0x104   :  { %450 = vtanh.f32 %v370_v25  ;;  %v207_v47 = vadd.f32 %v199_v33, %v167_v27  ;;  %v211_v48 = vadd.f32 %v203_v34, %v171_v29  ;;  %v140_v51 = vmul.f32 %v133_v4, %v653_v36  ;;  %v739_v4 = vpop.permute.xlu0 %179 }
 0x105   :  { %452 = vtanh.f32 %v220_v28  ;;  %v213_v52 = vadd.f32 %v205_v35, %v173_v30  ;;  %v327_v53 = vmul.f32 %v325_v39, %v661_v41  ;;  %v331_v54 = vmul.f32 %v325_v39, %v655_v37 }
 0x106   :  { %454 = vtanh.f32 %v372_v31  ;;  %v215_v55 = vmul.f32 0.5, %v207_v47  ;;  %v219_v56 = vmul.f32 0.5, %v211_v48  ;;  %v333_v57 = vmul.f32 %v325_v39, %v665_v45 }
 0x107   :  { %v221_v49 = vmul.f32 0.5, %v213_v52  ;;  %v335_v50 = vadd.f32 %v327_v53, %v657_v38  ;;  %v339_v9 = vadd.f32 %v331_v54, %v659_v40  ;;  %v351_v58 = vmul.f32 %v729_v44, %v663_v43 }
 0x108   :  { %456 = vtanh.f32 %v215_v55  ;;  %v341_v59 = vadd.f32 %v333_v57, %v164_v42  ;;  %v355_v37 = vmul.f32 %v729_v44, %v667_v46  ;;  %v357_v41 = vmul.f32 %v729_v44, %v188_v32 }
 0x109   :  { %458 = vtanh.f32 %v219_v56  ;;  %v359_v60 = vadd.f32 %v351_v58, %v335_v50  ;;  %v141_v45 = vmul.f32 %v686_v18, %v653_v36  ;;  %v168_v38 = vadd.f32 %v673_v61, %v140_v51 }
 0x10a   :  { %460 = vtanh.f32 %v221_v49  ;;  %v363_v40 = vadd.f32 %v355_v37, %v339_v9  ;;  %v365_v62 = vadd.f32 %v357_v41, %v341_v59  ;;  %v200_v43 = vmul.f32 %v677_v8, %v739_v4 }
 0x10b   :  { %v445_v63 = vpop.eup %444  ;;  %v367_v42 = vmul.f32 0.5, %v359_v60  ;;  %v169_v0 = vadd.f32 %v673_v61, %v141_v45  ;;  %v201_v46 = vmul.f32 %v689_v22, %v739_v4  ;;  %v328_v32 = vmul.f32 %v680_v13, %v653_v36 }
 0x10c   :  { %v447_v24 = vpop.eup %446  ;;  %v230_v18 = vadd.f32 1.0, %v445_v63  ;;  %v371_v25 = vmul.f32 0.5, %v363_v40  ;;  %v373_v26 = vmul.f32 0.5, %v365_v62  ;;  %v208_v27 = vadd.f32 %v200_v43, %v168_v38 }
 0x10d   :  { %v449_v28 = vpop.eup %448  ;;  %v234_v29 = vadd.f32 1.0, %v447_v24  ;;  %462 = vtanh.f32 %v367_v42  ;;  %v209_v30 = vadd.f32 %v201_v46, %v169_v0  ;;  %v329_v8 = vmul.f32 %v325_v39, %v653_v36 }
 0x10e   :  { %v451_v31 = vpop.eup %450  ;;  %v238_v33 = vmul.f32 0.5, %v230_v18  ;;  %v382_v34 = vadd.f32 1.0, %v449_v28  ;;  %464 = vtanh.f32 %v371_v25  ;;  %v216_v35 = vmul.f32 0.5, %v208_v27 }
 0x10f   :  { %v453_v22 = vpop.eup %452  ;;  %v242_v47 = vmul.f32 0.5, %v234_v29  ;;  %v386_v48 = vadd.f32 1.0, %v451_v31  ;;  %466 = vtanh.f32 %v373_v26  ;;  %v217_v13 = vmul.f32 0.5, %v209_v30 }
 0x110   :  { %v455_v51 = vpop.eup %454  ;;  %v246_v52 = vmul.f32 %v238_v33, %v585_v6  ;;  %v390_v53 = vmul.f32 0.5, %v382_v34  ;;  %v236_v54 = vadd.f32 1.0, %v453_v22  ;;  %468 = vtanh.f32 %v216_v35 }
 0x111   :  { %v250_v55 = vmul.f32 %v242_v47, %v611_v19  ;;  %v394_v56 = vmul.f32 0.5, %v386_v48  ;;  %v388_v36 = vadd.f32 1.0, %v455_v51  ;;  %470 = vtanh.f32 %v217_v13 }
 0x112   :  { %v457_v39 = vpop.eup %456  ;;  %254 = vst [vmem:[#allocation5] sm:$0xff] %v246_v52  ;;  %v398_v57 = vmul.f32 %v390_v53, %v593_v10  ;;  %v244_v49 = vmul.f32 0.5, %v236_v54  ;;  %v336_v50 = vadd.f32 %v328_v32, %v673_v61  ;;  %v337_v9 = vadd.f32 %v329_v8, %v673_v61 }
 0x113   :  { %v459_v58 = vpop.eup %458  ;;  %258 = vst [vmem:[#allocation5 + $0x20] sm:$0xff] %v250_v55  ;;  %v402_v6 = vmul.f32 %v394_v56, %v615_v21  ;;  %v396_v59 = vmul.f32 0.5, %v388_v36  ;;  %v231_v37 = vadd.f32 1.0, %v457_v39  ;;  %v352_v19 = vmul.f32 %v683_v17, %v739_v4 }
 0x114   :  { %v461_v41 = vpop.eup %460  ;;  %407 = vst [vmem:[#allocation5 + $0x40] sm:$0xff] %v398_v57  ;;  %v252_v60 = vmul.f32 %v244_v49, %v613_v20  ;;  %v235_v45 = vadd.f32 1.0, %v459_v58  ;;  %v353_v10 = vmul.f32 %v729_v44, %v739_v4 }
 0x115   :  { %411 = vst [vmem:[#allocation5 + $0x60] sm:$0xff] %v402_v6  ;;  %v404_v61 = vmul.f32 %v396_v59, %v619_v23  ;;  %v237_v38 = vadd.f32 1.0, %v461_v41  ;;  %v239_v40 = vmul.f32 0.5, %v231_v37  ;;  %v360_v62 = vadd.f32 %v352_v19, %v336_v50 }
 0x116   :  { %260 = vst [vmem:[#allocation5 + $0x30] sm:$0xff] %v252_v60  ;;  %v243_v21 = vmul.f32 0.5, %v235_v45  ;;  %v361_v43 = vadd.f32 %v353_v10, %v337_v9 }
 0x117   :  { %v463_v63 = vpop.eup %462  ;;  %413 = vst [vmem:[#allocation5 + $0x70] sm:$0xff] %v404_v61  ;;  %v245_v17 = vmul.f32 0.5, %v237_v38  ;;  %v247_v42 = vmul.f32 %v239_v40, %v575_v1  ;;  %v368_v0 = vmul.f32 0.5, %v360_v62 }
 0x118   :  { %v465_v20 = vpop.eup %464  ;;  %v251_v46 = vmul.f32 %v243_v21, %v597_v12  ;;  %v383_v32 = vadd.f32 1.0, %v463_v63  ;;  %v369_v44 = vmul.f32 0.5, %v361_v43 }
 0x119   :  { %v467_v4 = vpop.eup %466  ;;  %v253_v23 = vmul.f32 %v245_v17, %v601_v14  ;;  %255 = vst [vmem:[#allocation5 + $0x8] sm:$0xff] %v247_v42  ;;  %v387_v24 = vadd.f32 1.0, %v465_v20  ;;  %472 = vtanh.f32 %v368_v0 }
 0x11a   :  { %v469_v18 = vpop.eup %468  ;;  %259 = vst [vmem:[#allocation5 + $0x28] sm:$0xff] %v251_v46  ;;  %v389_v25 = vadd.f32 1.0, %v467_v4  ;;  %v391_v26 = vmul.f32 0.5, %v383_v32  ;;  %474 = vtanh.f32 %v369_v44 }
 0x11b   :  { %v471_v27 = vpop.eup %470  ;;  %261 = vst [vmem:[#allocation5 + $0x38] sm:$0xff] %v253_v23  ;;  %v395_v1 = vmul.f32 0.5, %v387_v24  ;;  %v232_v28 = vadd.f32 1.0, %v469_v18 }
 0x11c   :  { %v397_v29 = vmul.f32 0.5, %v389_v25  ;;  %v399_v12 = vmul.f32 %v391_v26, %v579_v3  ;;  %v233_v30 = vadd.f32 1.0, %v471_v27 }
 0x11d   :  { %v403_v8 = vmul.f32 %v395_v1, %v603_v15  ;;  %v240_v31 = vmul.f32 0.5, %v232_v28 }
 0x11e   :  { %v405_v14 = vmul.f32 %v397_v29, %v605_v16  ;;  %408 = vst [vmem:[#allocation5 + $0x48] sm:$0xff] %v399_v12  ;;  %v241_v33 = vmul.f32 0.5, %v233_v30 }
 0x11f   :  { %412 = vst [vmem:[#allocation5 + $0x68] sm:$0xff] %v403_v8  ;;  %v248_v34 = vmul.f32 %v240_v31, %v587_v7 }
 0x120   :  { %414 = vst [vmem:[#allocation5 + $0x78] sm:$0xff] %v405_v14  ;;  %v249_v35 = vmul.f32 %v241_v33, %v577_v2 }
 0x121   :  { %256 = vst [vmem:[#allocation5 + $0x10] sm:$0xff] %v248_v34 }
 0x122   :  { %257 = vst [vmem:[#allocation5 + $0x18] sm:$0xff] %v249_v35 }
 0x123   :  { %v473_v22 = vpop.eup %472 }
 0x124   :  { %v475_v47 = vpop.eup %474  ;;  %v384_v48 = vadd.f32 1.0, %v473_v22 }
 0x125   :  { %v385_v3 = vadd.f32 1.0, %v475_v47 }
 0x126   :  { %v392_v13 = vmul.f32 0.5, %v384_v48 }
 0x127   :  { %v393_v15 = vmul.f32 0.5, %v385_v3 }
 0x128   :  { %v400_v16 = vmul.f32 %v392_v13, %v595_v11 }
 0x129   :  { %v401_v51 = vmul.f32 %v393_v15, %v583_v5 }
 0x12a   :  { %409 = vst [vmem:[#allocation5 + $0x50] sm:$0xff] %v400_v16 }
 0x12b   :  { %410 = vst [vmem:[#allocation5 + $0x58] sm:$0xff] %v401_v51 }
 0x12c   :  { %509 = shalt.err (!%p506_p12)
}
 0x12d   :  { %s510_s27 = scalar_lea.hbm %s797_s5, 2048 }
 0x12e   :  { %p511_p13 = scmp.ne.s32.totalorder %s797_s5, %s510_s27  ;;  %p514_p0 = scmp.lt.u32.totalorder %s510_s27, %s797_s5 }
 0x130   :  { %p516_p1 = pnand %p514_p0, %p511_p13 }
 0x132   :  { %519 = shalt.err (!%p516_p1)
}
 0x133   :  { %426 = dma.vmem_to_hbm [thread:$0]  %s421_s4, 2048, %s797_s5, [#allocation4], %s525_s28, %s525_s28, %s526_s29  }
 0x134   :  { %522 = dma.done.wait [#allocation4], 2048  }
 0x135   :  { %523 = vsyncadd [#allocation4], 4294965248 }
 0x136   :  { %430 = vsyncpa [#allocation3], 1 }
 0x137   :  { %431 = vsyncpa [#allocation4], 1 }

</bundles_post_ra>
